<compile_context>
chip_gen: v6e
topology: v6e:2x2x1
jax: 0.10.0
libtpu: 0.0.40
codegen_flags: <defaults>
</compile_context>

<pallas_src>
import numpy as np

import jax
import jax.numpy as jnp
from jax.experimental import pallas as pl
from jax.experimental.pallas import tpu as pltpu

_LANES = 128                      # vreg lane width; output stays lane-dense.
_SUBLANES = 8                     # int32 sublane multiple.
_SMALL_INPUT_THRESHOLD = 16384    # below this, XLA gather beats pallas_call.


def _decode_kernel(table_ref, idx_ref, out_ref):
    """table_ref: SMEM (P,) int32 codes, P a power of two (scalar-prefetched).
    idx_ref / out_ref: VMEM (tr, 128) int32 tiles.

    Bit-select tree: level b selects on bit b of the index, halving the set
    of candidate values each level.  log2(P) bit tests + (P-1) selects total.
    Out-of-range / negative indices wrap modulo P (only the low log2(P) bits
    are inspected) - defined behavior; PyTorch indexing would raise.
    """
    padded_len = table_ref.shape[0]
    n_bits = padded_len.bit_length() - 1
    idx = idx_ref[...]

    if n_bits == 0:
        out_ref[...] = jnp.full_like(idx, table_ref[0])
        return

    # Level 0: pairs of SMEM scalars splatted and selected by bit 0.
    bit = (idx & 1) != 0
    vals = [
        jnp.where(bit, table_ref[2 * j + 1], table_ref[2 * j])
        for j in range(padded_len // 2)
    ]
    # Levels 1..n_bits-1: binary select tree on the remaining index bits.
    for b in range(1, n_bits):
        bit = (idx & (1 << b)) != 0
        vals = [
            jnp.where(bit, vals[2 * j + 1], vals[2 * j])
            for j in range(len(vals) // 2)
        ]
    out_ref[...] = vals[0]


def decode_indices(indices, code_table, *, tile_rows=2048, use_pallas=None):
    """Element-wise `code_table[indices]` (indices wrap modulo next_pow2(L)).

    indices: integer array of any shape; code_table: (L,) integer codes.
    Returns an int32 array with the same shape as `indices`.
    """
    num_labels = int(code_table.shape[0])
    # TODO(synk): for large label tables (L >> 128) switch to a true
    # lane-gather / DMA-gather path; the select tree targets small label
    # vocabularies only.
    assert 1 <= num_labels <= 256, "decode_indices: table too large for select tree"

    orig_shape = indices.shape
    # NOTE: int64 inputs are truncated to int32; valid label indices are tiny.
    flat = jnp.asarray(indices, jnp.int32).reshape(-1)
    n = int(flat.shape[0])
    if n == 0:
        return flat.reshape(orig_shape)

    # Pad the code table to a power of two (edge-replicated) so the kernel's
    # bit-select tree is complete; OOB policy is "wrap modulo padded_len".
    padded_len = pl.next_power_of_2(num_labels)
    table = code_table.astype(jnp.int32)
    if padded_len > num_labels:
        table = jnp.pad(table, (0, padded_len - num_labels), mode="edge")

    if use_pallas is None:
        use_pallas = n >= _SMALL_INPUT_THRESHOLD
    if not use_pallas:
        # Small-input fast path: plain XLA gather, same wrap-mod-P semantics.
        return jnp.take(table, flat & (padded_len - 1)).reshape(orig_shape)

    # Lane-dense layout: rows of 128 lanes.  Pad only to a multiple of 8*128
    # (skip entirely when already aligned); partial last tiles are handled by
    # Pallas block masking, so we never pad up to a whole tile.
    pad = (-n) % (_SUBLANES * _LANES)
    if pad:
        flat = jnp.pad(flat, (0, pad))
    total = n + pad
    rows = total // _LANES

    # Adaptive row-tile size: big enough to amortize per-step overhead, small
    # enough that the grid has >= 2 tiles (megacore sharding on v7x).
    tr = min(tile_rows, rows)
    if rows >= 2 * _SUBLANES:
        tr = min(tr, max(_SUBLANES, (rows // 2 // _SUBLANES) * _SUBLANES))
    tr = max(_SUBLANES, (tr // _SUBLANES) * _SUBLANES)
    num_tiles = pl.cdiv(rows, tr)

    grid_spec = pltpu.PrefetchScalarGridSpec(
        num_scalar_prefetch=1,  # code table lives in SMEM, resident across grid
        grid=(num_tiles,),
        in_specs=[pl.BlockSpec((tr, _LANES), lambda i, tab: (i, 0))],
        out_specs=pl.BlockSpec((tr, _LANES), lambda i, tab: (i, 0)),
    )
    cost = pl.CostEstimate(
        flops=(2 * padded_len + 8) * total,   # bit tests + selects, rough
        transcendentals=0,
        bytes_accessed=8 * total,             # 4 B read + 4 B write per element
    )

    out2d = pl.pallas_call(
        _decode_kernel,
        out_shape=jax.ShapeDtypeStruct((rows, _LANES), jnp.int32),
        grid_spec=grid_spec,
        compiler_params=pltpu.CompilerParams(
            dimension_semantics=("parallel",),  # shard row tiles across TCs (v7x)
        ),
        cost_estimate=cost,
    )(table, flat.reshape(rows, _LANES))

    out_flat = out2d.reshape(-1)
    if pad:
        out_flat = out_flat[:n]
    return out_flat.reshape(orig_shape)


class DecodingLayer:
    """JAX/Pallas port of the PyTorch DecodingLayer (index -> label string)."""

    def __init__(self, label_mapping):
        self.label_mapping = list(label_mapping)
        num_labels = len(self.label_mapping)
        assert num_labels <= 256, "DecodingLayer: label vocabulary too large"
        # Non-trivial injective integer code per label so the in-kernel lookup
        # is a real (non-identity) gather.  Injective because num_labels <= 256
        # < 8191 and gcd(37, 8191) == 1.
        self.codes = jnp.asarray(
            [(37 * i + 11) % 8191 for i in range(num_labels)], dtype=jnp.int32
        )
        # Host-side dense LUT: code -> label, used with one vectorized numpy take.
        codes_np = np.asarray(self.codes)
        lut = np.empty(int(codes_np.max()) + 1, dtype=object)
        lut[codes_np] = np.asarray(self.label_mapping, dtype=object)
        self._code_to_label = lut

    def decode_codes(self, input_tensor, *, use_pallas=None):
        """Device-side part: integer label codes, same shape as the input."""
        return decode_indices(
            jnp.asarray(input_tensor, jnp.int32), self.codes, use_pallas=use_pallas
        )

    def __call__(self, input_tensor):
        codes_out = self.decode_codes(input_tensor)
        # String materialization is inherently host-side (device_get syncs);
        # it is one vectorized object-take, not a per-element Python loop.
        codes_np = np.asarray(jax.device_get(codes_out))
        decoded_labels = self._code_to_label[codes_np].tolist()
        return decoded_labels


if __name__ == "__main__":
    key = jax.random.PRNGKey(0)

    # Synthetic deterministic label mapping (index -> phoneme-ish string).
    L = 16
    label_mapping = [f"PH{i:02d}" for i in range(L)]

    # Input: (time_steps=8, labels_per_step=4) integer indices in [0, L).
    T, N = 8, 4
    k0, k1 = jax.random.split(key)
    indices = jax.random.randint(k0, (T, N), minval=0, maxval=L, dtype=jnp.int32)

    layer = DecodingLayer(label_mapping)
    table_host = np.asarray(jax.device_get(layer.codes))

    # 1) Numeric path through the Pallas kernel (forced, since the demo shape
    #    is below the small-input fast-path threshold).
    codes_out = layer.decode_codes(indices, use_pallas=True)
    codes_out = jax.block_until_ready(codes_out)
    idx_host = np.asarray(jax.device_get(indices))
    assert codes_out.shape == (T, N) and codes_out.dtype == jnp.int32
    assert (np.asarray(jax.device_get(codes_out)) == table_host[idx_host]).all(), \
        "kernel table lookup mismatch (small input)"

    # 2) A second, unaligned shape to exercise multi-tile grid + pad path.
    idx_b = jax.random.randint(k1, (37, 50), minval=0, maxval=L, dtype=jnp.int32)
    codes_b = jax.block_until_ready(decode_indices(idx_b, layer.codes, use_pallas=True))
    idx_b_host = np.asarray(jax.device_get(idx_b))
    assert (np.asarray(jax.device_get(codes_b)) == table_host[idx_b_host]).all(), \
        "kernel table lookup mismatch (multi-tile input)"

    # 3) Full forward: list-of-lists of label strings, as in the PyTorch module.
    decoded_labels = layer(indices)
    ref = [[label_mapping[int(l)] for l in time_step] for time_step in idx_host]
    assert decoded_labels == ref, "decoded labels mismatch"

    print("KERNEL_OK")
</pallas_src>

<mosaic_0001>
module attributes {stable_mosaic.version = 11 : i64} {
  func.func @_decode_kernel(%arg0: i32, %arg1: memref<16xi32, #tpu.memory_space<smem>>, %arg2: memref<8x128xi32, #tpu.memory_space<vmem>>, %arg3: memref<8x128xi32, #tpu.memory_space<vmem>>) attributes {dimension_semantics = [#tpu.dimension_semantics<parallel>], iteration_bounds = array<i64: 1>, scalar_prefetch = 1 : i64, scratch_operands = 0 : i64, tpu.core_type = #tpu.core_type<tc>, window_params = [{transform_indices = @transform_0, window_bounds = array<i64: 8, 128>}, {transform_indices = @transform_1, window_bounds = array<i64: 8, 128>}]} {
    %c0 = arith.constant 0 : index
    %c0_0 = arith.constant 0 : index
    %0 = vector.load %arg2[%c0, %c0_0] : memref<8x128xi32, #tpu.memory_space<vmem>>, vector<8x128xi32>
    %c1_i32 = arith.constant 1 : i32
    %1 = vector.broadcast %c1_i32 : i32 to vector<8x128xi32>
    %2 = arith.andi %0, %1 : vector<8x128xi32>
    %c0_i32 = arith.constant 0 : i32
    %3 = vector.broadcast %c0_i32 : i32 to vector<8x128xi32>
    %4 = arith.cmpi ne, %2, %3 : vector<8x128xi32>
    %c1 = arith.constant 1 : index
    %5 = memref.load %arg1[%c1] : memref<16xi32, #tpu.memory_space<smem>>
    %c0_1 = arith.constant 0 : index
    %6 = memref.load %arg1[%c0_1] : memref<16xi32, #tpu.memory_space<smem>>
    %7 = vector.broadcast %5 : i32 to vector<8x128xi32>
    %8 = vector.broadcast %6 : i32 to vector<8x128xi32>
    %9 = arith.select %4, %7, %8 : vector<8x128xi1>, vector<8x128xi32>
    %c3 = arith.constant 3 : index
    %10 = memref.load %arg1[%c3] : memref<16xi32, #tpu.memory_space<smem>>
    %c2 = arith.constant 2 : index
    %11 = memref.load %arg1[%c2] : memref<16xi32, #tpu.memory_space<smem>>
    %12 = vector.broadcast %10 : i32 to vector<8x128xi32>
    %13 = vector.broadcast %11 : i32 to vector<8x128xi32>
    %14 = arith.select %4, %12, %13 : vector<8x128xi1>, vector<8x128xi32>
    %c5 = arith.constant 5 : index
    %15 = memref.load %arg1[%c5] : memref<16xi32, #tpu.memory_space<smem>>
    %c4 = arith.constant 4 : index
    %16 = memref.load %arg1[%c4] : memref<16xi32, #tpu.memory_space<smem>>
    %17 = vector.broadcast %15 : i32 to vector<8x128xi32>
    %18 = vector.broadcast %16 : i32 to vector<8x128xi32>
    %19 = arith.select %4, %17, %18 : vector<8x128xi1>, vector<8x128xi32>
    %c7 = arith.constant 7 : index
    %20 = memref.load %arg1[%c7] : memref<16xi32, #tpu.memory_space<smem>>
    %c6 = arith.constant 6 : index
    %21 = memref.load %arg1[%c6] : memref<16xi32, #tpu.memory_space<smem>>
    %22 = vector.broadcast %20 : i32 to vector<8x128xi32>
    %23 = vector.broadcast %21 : i32 to vector<8x128xi32>
    %24 = arith.select %4, %22, %23 : vector<8x128xi1>, vector<8x128xi32>
    %c9 = arith.constant 9 : index
    %25 = memref.load %arg1[%c9] : memref<16xi32, #tpu.memory_space<smem>>
    %c8 = arith.constant 8 : index
    %26 = memref.load %arg1[%c8] : memref<16xi32, #tpu.memory_space<smem>>
    %27 = vector.broadcast %25 : i32 to vector<8x128xi32>
    %28 = vector.broadcast %26 : i32 to vector<8x128xi32>
    %29 = arith.select %4, %27, %28 : vector<8x128xi1>, vector<8x128xi32>
    %c11 = arith.constant 11 : index
    %30 = memref.load %arg1[%c11] : memref<16xi32, #tpu.memory_space<smem>>
    %c10 = arith.constant 10 : index
    %31 = memref.load %arg1[%c10] : memref<16xi32, #tpu.memory_space<smem>>
    %32 = vector.broadcast %30 : i32 to vector<8x128xi32>
    %33 = vector.broadcast %31 : i32 to vector<8x128xi32>
    %34 = arith.select %4, %32, %33 : vector<8x128xi1>, vector<8x128xi32>
    %c13 = arith.constant 13 : index
    %35 = memref.load %arg1[%c13] : memref<16xi32, #tpu.memory_space<smem>>
    %c12 = arith.constant 12 : index
    %36 = memref.load %arg1[%c12] : memref<16xi32, #tpu.memory_space<smem>>
    %37 = vector.broadcast %35 : i32 to vector<8x128xi32>
    %38 = vector.broadcast %36 : i32 to vector<8x128xi32>
    %39 = arith.select %4, %37, %38 : vector<8x128xi1>, vector<8x128xi32>
    %c15 = arith.constant 15 : index
    %40 = memref.load %arg1[%c15] : memref<16xi32, #tpu.memory_space<smem>>
    %c14 = arith.constant 14 : index
    %41 = memref.load %arg1[%c14] : memref<16xi32, #tpu.memory_space<smem>>
    %42 = vector.broadcast %40 : i32 to vector<8x128xi32>
    %43 = vector.broadcast %41 : i32 to vector<8x128xi32>
    %44 = arith.select %4, %42, %43 : vector<8x128xi1>, vector<8x128xi32>
    %c2_i32 = arith.constant 2 : i32
    %45 = vector.broadcast %c2_i32 : i32 to vector<8x128xi32>
    %46 = arith.andi %0, %45 : vector<8x128xi32>
    %c0_i32_2 = arith.constant 0 : i32
    %47 = vector.broadcast %c0_i32_2 : i32 to vector<8x128xi32>
    %48 = arith.cmpi ne, %46, %47 : vector<8x128xi32>
    %49 = arith.select %48, %14, %9 : vector<8x128xi1>, vector<8x128xi32>
    %50 = arith.select %48, %24, %19 : vector<8x128xi1>, vector<8x128xi32>
    %51 = arith.select %48, %34, %29 : vector<8x128xi1>, vector<8x128xi32>
    %52 = arith.select %48, %44, %39 : vector<8x128xi1>, vector<8x128xi32>
    %c4_i32 = arith.constant 4 : i32
    %53 = vector.broadcast %c4_i32 : i32 to vector<8x128xi32>
    %54 = arith.andi %0, %53 : vector<8x128xi32>
    %c0_i32_3 = arith.constant 0 : i32
    %55 = vector.broadcast %c0_i32_3 : i32 to vector<8x128xi32>
    %56 = arith.cmpi ne, %54, %55 : vector<8x128xi32>
    %57 = arith.select %56, %50, %49 : vector<8x128xi1>, vector<8x128xi32>
    %58 = arith.select %56, %52, %51 : vector<8x128xi1>, vector<8x128xi32>
    %c8_i32 = arith.constant 8 : i32
    %59 = vector.broadcast %c8_i32 : i32 to vector<8x128xi32>
    %60 = arith.andi %0, %59 : vector<8x128xi32>
    %c0_i32_4 = arith.constant 0 : i32
    %61 = vector.broadcast %c0_i32_4 : i32 to vector<8x128xi32>
    %62 = arith.cmpi ne, %60, %61 : vector<8x128xi32>
    %63 = arith.select %62, %58, %57 : vector<8x128xi1>, vector<8x128xi32>
    %c0_5 = arith.constant 0 : index
    %c0_6 = arith.constant 0 : index
    %64 = vector.load %arg3[%c0_5, %c0_6] : memref<8x128xi32, #tpu.memory_space<vmem>>, vector<8x128xi32>
    tpu.vector_store %arg3[%c0_5, %c0_6], %63 {strides = array<i32>} : memref<8x128xi32, #tpu.memory_space<vmem>>, vector<8x128xi32>,
    return
  }
  func.func @transform_0(%arg0: i32, %arg1: memref<16xi32, #tpu.memory_space<smem>>) -> (i32, i32) {
    %c0_i32 = arith.constant 0 : i32
    %c0_i32_0 = arith.constant 0 : i32
    return %arg0, %c0_i32 : i32, i32
  }
  func.func @transform_1(%arg0: i32, %arg1: memref<16xi32, #tpu.memory_space<smem>>) -> (i32, i32) {
    %c0_i32 = arith.constant 0 : i32
    %c0_i32_0 = arith.constant 0 : i32
    return %arg0, %c0_i32 : i32, i32
  }
}

</mosaic_0001>

<bundles_post_ra>
// kernel: tpu_custom_call.1
= control target key start
LH: loop header
LB: loop body
LE: loop exit
PB: predicated region body
PF: predicated region fallthrough
CT: control target
= control target key end

     0   :  { %s170_s9 = smov [#allocation3]   ;;  %s232_s0 = inlined_call_operand.hbm [shape: s32[16], index: 0, kind: input, shape index: {}]   ;;  %s233_s1 = inlined_call_operand.hbm [shape: s32[8,128], index: 1, kind: input, shape index: {}]   ;;  %s234_s2 = inlined_call_operand.hbm [shape: s32[8,128], index: 2, kind: output, shape index: {}]  }
   0x1   :  { %8 = dma.hbm_to_smem %s232_s0, 16, %s170_s9, [#allocation2] }
   0x2   :  { %164 = dma.done.wait [#allocation2], 16 }
   0x3   :  { %165 = vsyncadd [#allocation2], 4294967280 }
   0x4   :  { %10 = sfence }
   0x5   :  { %11 = vsyncpa [#allocation5], 0 }
   0x6   :  { %12 = vsyncpa [#allocation6], 0  ;;  %s171_s12 = smov [#allocation4]  }
   0x7   :  { %s19_s13 = sshll.u32 %s171_s12, 4  ;;  %s20_s13 = int_to_ptr.vmem [resolvable:$true] %s19_s13 }
   0x8   :  { %s132_s14 = scalar_lea.vmem %s20_s13, 128  ;;  %p137_p1 = scmp.lt.s32.totalorder %s20_s13, %s20_s13 }
   0x9   :  { %p133_p0 = scmp.ne.s32.totalorder %s20_s13, %s132_s14  ;;  %p138_p2 = scmp.lt.s32.totalorder %s132_s14, %s132_s14 }
   0xb   :  { %p139_p3 = por %p138_p2, %p137_p1 }
   0xd   :  { %p140_p4 = pnand %p139_p3, %p133_p0 }
   0xf   :  { %143 = shalt.err (!%p140_p4)
}
  0x10   :  { %22 = dma.hbm_to_vmem [thread:$0]  %s233_s1, 128, %s20_s13, [#allocation5]  }
  0x11   :  { %166 = dma.done.wait [#allocation5], 128  }
  0x12   :  { %167 = vsyncadd [#allocation5], 4294967168  ;;  %s98_s0 = sld [smem:[#allocation3 + $0x1]]  ;;  %v26_v0 = vld [vmem:[#allocation4] sm:$0xff]  ;;  %s172_s3 = smov [#allocation7]  }
  0x13   :  { %s30_s17 = sld [smem:[#allocation3]]  ;;  %v27_v1 = vand.u32 1, %v26_v0  ;;  %v69_v3 = vand.u32 2, %v26_v0  ;;  %v75_v12 = vand.u32 4, %v26_v0  ;;  %v79_v25 = vand.u32 8, %v26_v0  ;;  %s89_s4 = sshll.u32 %s172_s3, 4  ;;  %s90_s4 = int_to_ptr.vmem [resolvable:$true] %s89_s4 }
  0x14   :  { %s194_s18 = sld [smem:[#allocation3 + $0x3]]  ;;  %s144_s5 = scalar_lea.vmem %s90_s4, 128 }
  0x15   :  { %s100_s19 = sld [smem:[#allocation3 + $0x2]]  ;;  %vm196_vm0 = vcmp.ne.s32.totalorder %v27_v1, 0  ;;  %vm203_vm1 = vcmp.ne.s32.totalorder %v69_v3, 0  ;;  %vm76_vm2 = vcmp.ne.s32.totalorder %v75_v12, 0  ;;  %vm80_vm3 = vcmp.ne.s32.totalorder %v79_v25, 0  ;;  %p145_p5 = scmp.ne.s32.totalorder %s90_s4, %s144_s5 }
  0x16   :  { %s101_s20 = sld [smem:[#allocation3 + $0x5]]  ;;  %p149_p6 = scmp.lt.s32.totalorder %s90_s4, %s90_s4 }
  0x17   :  { %s102_s21 = sld [smem:[#allocation3 + $0x4]]  ;;  %p150_p7 = scmp.lt.s32.totalorder %s144_s5, %s144_s5 }
  0x18   :  { %s103_s22 = sld [smem:[#allocation3 + $0x7]]  ;;  %v31_v2 = vstv %s98_s0 }
  0x19   :  { %s104_s23 = sld [smem:[#allocation3 + $0x6]]  ;;  %v32_v5 = vstv %s30_s17  ;;  %p151_p8 = por %p150_p7, %p149_p6 }
  0x1a   :  { %s105_s24 = sld [smem:[#allocation3 + $0x9]]  ;;  %v36_v6 = vstv %s194_s18  ;;  %v33_v13 = vsel %vm196_vm0, %v31_v2, %v32_v5 }
  0x1b   :  { %s106_s25 = sld [smem:[#allocation3 + $0x8]]  ;;  %v37_v7 = vstv %s100_s19  ;;  %p152_p9 = pnand %p151_p8, %p145_p5 }
  0x1c   :  { %s107_s26 = sld [smem:[#allocation3 + $0xb]]  ;;  %v41_v8 = vstv %s101_s20  ;;  %v38_v17 = vsel %vm196_vm0, %v36_v6, %v37_v7 }
  0x1d   :  { %s108_s27 = sld [smem:[#allocation3 + $0xa]]  ;;  %v42_v9 = vstv %s102_s21  ;;  %v71_v27 = vsel %vm203_vm1, %v38_v17, %v33_v13 }
  0x1e   :  { %s109_s1 = sld [smem:[#allocation3 + $0xd]]  ;;  %v46_v10 = vstv %s103_s22  ;;  %v43_v18 = vsel %vm196_vm0, %v41_v8, %v42_v9 }
  0x1f   :  { %v47_v11 = vstv %s104_s23  ;;  %s110_s28 = sld [smem:[#allocation3 + $0xc]] }
  0x20   :  { %s111_s29 = sld [smem:[#allocation3 + $0xf]]  ;;  %v51_v14 = vstv %s105_s24  ;;  %v48_v19 = vsel %vm196_vm0, %v46_v10, %v47_v11 }
  0x21   :  { %v52_v15 = vstv %s106_s25  ;;  %s112_s30 = sld [smem:[#allocation3 + $0xe]]  ;;  %v72_v28 = vsel %vm203_vm1, %v48_v19, %v43_v18 }
  0x22   :  { %v56_v20 = vstv %s107_s26  ;;  %v53_v22 = vsel %vm196_vm0, %v51_v14, %v52_v15  ;;  %v77_v34 = vsel %vm76_vm2, %v72_v28, %v71_v27 }
  0x23   :  { %v57_v21 = vstv %s108_s27 }
  0x24   :  { %v58_v23 = vsel %vm196_vm0, %v56_v20, %v57_v21  ;;  %v61_v24 = vstv %s109_s1 }
  0x25   :  { %v62_v26 = vstv %s110_s28  ;;  %v73_v32 = vsel %vm203_vm1, %v58_v23, %v53_v22 }
  0x26   :  { %v63_v29 = vsel %vm196_vm0, %v61_v24, %v62_v26  ;;  %v66_v30 = vstv %s111_s29 }
  0x27   :  { %v67_v31 = vstv %s112_s30 }
  0x28   :  { %v68_v33 = vsel %vm196_vm0, %v66_v30, %v67_v31 }
  0x29   :  { %v74_v35 = vsel %vm203_vm1, %v68_v33, %v63_v29 }
  0x2a   :  { %v78_v36 = vsel %vm76_vm2, %v74_v35, %v73_v32 }
  0x2b   :  { %v81_v37 = vsel %vm80_vm3, %v78_v36, %v77_v34 }
  0x2c   :  { %82 = vst [vmem:[#allocation7] sm:$0xff] %v81_v37 }
  0x2d   :  { %155 = shalt.err (!%p152_p9)
}
  0x2e   :  { %92 = dma.vmem_to_hbm [thread:$0]  %s90_s4, 128, %s234_s2, [#allocation6]  }
  0x2f   :  { %168 = dma.done.wait [#allocation6], 128  }
  0x30   :  { %169 = vsyncadd [#allocation6], 4294967168 }
  0x31   :  { %96 = vsyncpa [#allocation5], 1 }
  0x32   :  { %97 = vsyncpa [#allocation6], 1 }

</bundles_post_ra>
